<compile_context>
chip_gen: v6e
topology: v6e:2x2x1
jax: 0.10.0
libtpu: 0.0.40
codegen_flags: <defaults>
</compile_context>

<pallas_src>
import functools

import jax
import jax.numpy as jnp
from jax.experimental import pallas as pl
from jax.experimental.pallas import tpu as pltpu

EPS = 1e-5
_LANE = 128
_STAT_ROWS = 8                       # per-channel stats broadcast into (8,128)


def _vmem_capacity_bytes():
    try:
        return int(pltpu.get_tpu_info().vmem_capacity_bytes)
    except Exception:
        return 64 * 1024 * 1024      # conservative fallback (v7x-sized)


def _pick_tiles(n_batch, n_rows, itemsize, target_elems):
    """Choose (batch_tile, row_tile) for the (N, C, R, 128) view."""
    sub = {4: 8, 2: 16, 1: 32}.get(itemsize, 8)   # sublanes per packed vreg
    max_rows = max(1, target_elems // _LANE)
    if n_rows <= max_rows:
        st = n_rows                               # full extent: contiguous DMA
    else:
        st = None
        start = max_rows - (max_rows % sub)
        for cand in range(start, 0, -sub):        # largest sub-multiple divisor
            if n_rows % cand == 0:
                st = cand
                break
        if st is None:                            # fall back to any divisor
            st = 1
            for cand in range(min(n_rows, max_rows), 0, -1):
                if n_rows % cand == 0:
                    st = cand
                    break
    max_nt = max(1, target_elems // (st * _LANE))
    nt = 1
    for cand in range(min(n_batch, max_nt), 0, -1):
        if n_batch % cand == 0:
            nt = cand
            break
    return nt, st


# --------------------------- two-pass kernels ------------------------------ #

def _stats_kernel(x_ref, mean_ref, rstd_ref, sum_acc, sq_acc, *, inv_m):
    nb = pl.program_id(1)
    rb = pl.program_id(2)
    first = (nb == 0) & (rb == 0)
    last = (nb == pl.num_programs(1) - 1) & (rb == pl.num_programs(2) - 1)

    @pl.when(first)
    def _():
        sum_acc[...] = jnp.zeros_like(sum_acc)
        sq_acc[...] = jnp.zeros_like(sq_acc)

    x = x_ref[...].astype(jnp.float32)            # (nt, st, 128)
    nt, st, lane = x.shape
    acc_rows = sum_acc.shape[0]
    if acc_rows > 1:
        # Layout-free regrouping (st % 8 == 0): pure VALU adds into (8,128).
        xr = x.reshape((nt * st) // acc_rows, acc_rows, lane)
        sum_acc[...] += jnp.sum(xr, axis=0)
        sq_acc[...] += jnp.sum(xr * xr, axis=0)
    else:
        sum_acc[...] += jnp.sum(x, axis=(0, 1), keepdims=True).reshape(1, lane)
        sq_acc[...] += jnp.sum(x * x, axis=(0, 1), keepdims=True).reshape(1, lane)

    @pl.when(last)
    def _():
        # One cross-lane reduce per channel (XLU), then EUP rsqrt.
        total = jnp.sum(sum_acc[...])
        total_sq = jnp.sum(sq_acc[...])
        mean = total * inv_m
        var = jnp.maximum(total_sq * inv_m - mean * mean, 0.0)
        rstd = jax.lax.rsqrt(var + EPS)
        mean_ref[...] = jnp.full(mean_ref.shape, mean, jnp.float32)
        rstd_ref[...] = jnp.full(rstd_ref.shape, rstd, jnp.float32)


def _norm_kernel(x_ref, mean_ref, rstd_ref, o_ref):
    x = x_ref[...].astype(jnp.float32)            # (nt, st, 128)
    mean = mean_ref[0:1, :]                       # (1, 128), lane-identical
    rstd = rstd_ref[0:1, :]
    y = (x - mean) * rstd
    o_ref[...] = jnp.maximum(y, 0.0).astype(o_ref.dtype)


# --------------------------- fused one-pass kernel -------------------------- #

def _fused_kernel(x_ref, o_ref, *, inv_m):
    x = x_ref[...].astype(jnp.float32)            # (n, r, 128), channel slab
    total = jnp.sum(x)
    total_sq = jnp.sum(x * x)
    mean = total * inv_m
    var = jnp.maximum(total_sq * inv_m - mean * mean, 0.0)
    rstd = jax.lax.rsqrt(var + EPS)
    o_ref[...] = jnp.maximum((x - mean) * rstd, 0.0).astype(o_ref.dtype)


# --------------------------------- wrapper ---------------------------------- #

def abn_forward(x, *, force_two_pass=False):
    """Training-mode BatchNorm2d(affine=False) + ReLU on an NCHW tensor."""
    n, c, h, w = x.shape
    hw = h * w
    itemsize = jnp.dtype(x.dtype).itemsize

    r = pl.cdiv(hw, _LANE)
    hw_pad = r * _LANE
    xf = x.reshape(n, c, hw)
    if hw_pad != hw:
        # Zero-pad HW to a lane multiple; zeros do not perturb sum / sum-of-
        # squares, and the true element count (n*hw) is used for the stats.
        xf = jnp.pad(xf, ((0, 0), (0, 0), (0, hw_pad - hw)))
    x4 = xf.reshape(n, c, r, _LANE)               # copy-free view after pad

    m = n * hw
    inv_m = 1.0 / m

    vmem_phys = _vmem_capacity_bytes()
    big_vmem = vmem_phys >= 100 * 1024 * 1024     # v5e/v6e: 128 MiB; v7x: 64 MiB
    vmem_cap = (64 if big_vmem else 32) * 1024 * 1024
    target_elems = (2 if big_vmem else 1) * 1024 * 1024

    x_bytes = n * c * hw_pad * itemsize
    stat_bytes = c * _STAT_ROWS * _LANE * 4
    slab_f32_bytes = n * r * _LANE * 4            # per-channel slab, f32

    # ---- fused single-pass path: per-channel slab resident in VMEM ----
    if (not force_two_pass) and slab_f32_bytes * 8 <= vmem_cap:
        slab_spec = pl.BlockSpec((n, None, r, _LANE), lambda ci: (0, ci, 0, 0))
        out4 = pl.pallas_call(
            functools.partial(_fused_kernel, inv_m=inv_m),
            out_shape=jax.ShapeDtypeStruct((n, c, r, _LANE), x.dtype),
            grid_spec=pltpu.PrefetchScalarGridSpec(
                num_scalar_prefetch=0,
                grid=(c,),
                in_specs=[slab_spec],
                out_specs=slab_spec),
            compiler_params=pltpu.CompilerParams(
                dimension_semantics=("parallel",),
                vmem_limit_bytes=vmem_cap),
            cost_estimate=pl.CostEstimate(
                flops=6 * n * hw_pad * c, transcendentals=c,
                bytes_accessed=2 * x_bytes),
        )(x4)
        out = out4.reshape(n, c, hw_pad)
        if hw_pad != hw:
            out = out[:, :, :hw]
        return out.reshape(n, c, h, w)

    # ---- two-pass streaming path ----
    nt, st = _pick_tiles(n, r, itemsize, target_elems)
    acc_rows = _STAT_ROWS if st % _STAT_ROWS == 0 else 1
    grid = (c, n // nt, r // st)

    x_spec = pl.BlockSpec((nt, None, st, _LANE),
                          lambda ci, ni, ri: (ni, ci, ri, 0))
    stat_spec = pl.BlockSpec((None, _STAT_ROWS, _LANE),
                             lambda ci, ni, ri: (ci, 0, 0))

    # pass 1: per-channel mean / rstd (streamed sum & sum-of-squares).
    # TODO(synk): consider pipeline_mode=pl.Buffered(3) on x_spec if xprof
    # shows exposed strided DMA on this pass.
    mean_b, rstd_b = pl.pallas_call(
        functools.partial(_stats_kernel, inv_m=inv_m),
        out_shape=(jax.ShapeDtypeStruct((c, _STAT_ROWS, _LANE), jnp.float32),
                   jax.ShapeDtypeStruct((c, _STAT_ROWS, _LANE), jnp.float32)),
        grid_spec=pltpu.PrefetchScalarGridSpec(
            num_scalar_prefetch=0,
            grid=grid,
            in_specs=[x_spec],
            out_specs=(stat_spec, stat_spec),
            scratch_shapes=[pltpu.VMEM((acc_rows, _LANE), jnp.float32),
                            pltpu.VMEM((acc_rows, _LANE), jnp.float32)]),
        compiler_params=pltpu.CompilerParams(
            dimension_semantics=("parallel", "arbitrary", "arbitrary"),
            vmem_limit_bytes=vmem_cap),
        cost_estimate=pl.CostEstimate(
            flops=3 * n * hw_pad * c, transcendentals=c,
            bytes_accessed=x_bytes + 2 * stat_bytes),
    )(x4)

    # pass 2: normalize + ReLU with lane-dense output blocks (all-parallel).
    out4 = pl.pallas_call(
        _norm_kernel,
        out_shape=jax.ShapeDtypeStruct((n, c, r, _LANE), x.dtype),
        grid_spec=pltpu.PrefetchScalarGridSpec(
            num_scalar_prefetch=0,
            grid=grid,
            in_specs=[x_spec, stat_spec, stat_spec],
            out_specs=x_spec),
        compiler_params=pltpu.CompilerParams(
            dimension_semantics=("parallel", "parallel", "parallel"),
            vmem_limit_bytes=vmem_cap),
        cost_estimate=pl.CostEstimate(
            flops=3 * n * hw_pad * c, transcendentals=0,
            bytes_accessed=2 * x_bytes + 2 * stat_bytes),
    )(x4, mean_b, rstd_b)

    out = out4.reshape(n, c, hw_pad)
    if hw_pad != hw:
        out = out[:, :, :hw]
    return out.reshape(n, c, h, w)


def _reference(x):
    # Pure-JAX reference of training-mode BatchNorm2d(affine=False) + ReLU.
    mean = jnp.mean(x, axis=(0, 2, 3), keepdims=True)
    var = jnp.mean((x - mean) ** 2, axis=(0, 2, 3), keepdims=True)
    return jnp.maximum((x - mean) / jnp.sqrt(var + EPS), 0.0)


if __name__ == "__main__":
    key0, key1 = jax.random.split(jax.random.PRNGKey(0))

    # Canonical small shape from the module: batch=2, channels=4, spatial=16.
    x = jax.random.normal(key0, (2, 4, 16, 16), dtype=jnp.float32)
    ref = _reference(x)

    out = abn_forward(x)                       # fused single-pass path
    jax.block_until_ready(out)
    assert out.shape == x.shape
    assert jnp.allclose(out, ref, atol=1e-4, rtol=1e-4), \
        float(jnp.max(jnp.abs(out - ref)))

    out2 = abn_forward(x, force_two_pass=True)  # streaming two-pass path
    jax.block_until_ready(out2)
    assert jnp.allclose(out2, ref, atol=1e-4, rtol=1e-4), \
        float(jnp.max(jnp.abs(out2 - ref)))

    # Non-lane-aligned spatial size (7x7) exercises the zero-padded path.
    x3 = jax.random.normal(key1, (2, 3, 7, 7), dtype=jnp.float32)
    out3 = abn_forward(x3)
    jax.block_until_ready(out3)
    ref3 = _reference(x3)
    assert jnp.allclose(out3, ref3, atol=1e-4, rtol=1e-4), \
        float(jnp.max(jnp.abs(out3 - ref3)))

    print("KERNEL_OK")
</pallas_src>

<mosaic_0001>
module attributes {stable_mosaic.version = 11 : i64} {
  func.func @_fused_kernel(%arg0: i32, %arg1: memref<2x1x2x128xf32, #tpu.memory_space<vmem>>, %arg2: memref<2x1x2x128xf32, #tpu.memory_space<vmem>>) attributes {dimension_semantics = [#tpu.dimension_semantics<parallel>], iteration_bounds = array<i64: 4>, scalar_prefetch = 0 : i64, scratch_operands = 0 : i64, tpu.core_type = #tpu.core_type<tc>, window_params = [{transform_indices = @transform_0, window_bounds = array<i64: 2, 1, 2, 128>}, {transform_indices = @transform_1, window_bounds = array<i64: 2, 1, 2, 128>}]} {
    %c0 = arith.constant 0 : index
    %c0_0 = arith.constant 0 : index
    %c0_1 = arith.constant 0 : index
    %c0_2 = arith.constant 0 : index
    %0 = vector.load %arg1[%c0, %c0_0, %c0_1, %c0_2] : memref<2x1x2x128xf32, #tpu.memory_space<vmem>>, vector<2x1x2x128xf32>
    %1 = vector.shape_cast %0 : vector<2x1x2x128xf32> to vector<2x2x128xf32>
    %2 = vector.shape_cast %1 : vector<2x2x128xf32> to vector<1x2x2x128xf32>
    %cst = arith.constant dense<0.000000e+00> : vector<1xf32>
    %3 = vector.multi_reduction <add>, %2, %cst [1, 2, 3] : vector<1x2x2x128xf32> to vector<1xf32>
    %4 = vector.shape_cast %3 : vector<1xf32> to vector<1x1x1x1xf32>
    %5 = vector.extract %4[0, 0, 0, 0] : f32 from vector<1x1x1x1xf32>
    %6 = arith.mulf %1, %1 : vector<2x2x128xf32>
    %7 = vector.shape_cast %6 : vector<2x2x128xf32> to vector<1x2x2x128xf32>
    %cst_3 = arith.constant dense<0.000000e+00> : vector<1xf32>
    %8 = vector.multi_reduction <add>, %7, %cst_3 [1, 2, 3] : vector<1x2x2x128xf32> to vector<1xf32>
    %9 = vector.shape_cast %8 : vector<1xf32> to vector<1x1x1x1xf32>
    %10 = vector.extract %9[0, 0, 0, 0] : f32 from vector<1x1x1x1xf32>
    %cst_4 = arith.constant 0.001953125 : f32
    %11 = arith.mulf %5, %cst_4 : f32
    %cst_5 = arith.constant 0.001953125 : f32
    %12 = arith.mulf %10, %cst_5 : f32
    %13 = arith.mulf %11, %11 : f32
    %14 = arith.subf %12, %13 : f32
    %cst_6 = arith.constant 0.000000e+00 : f32
    %15 = arith.maximumf %14, %cst_6 : f32
    %cst_7 = arith.constant 9.99999974E-6 : f32
    %16 = arith.addf %15, %cst_7 : f32
    %17 = math.rsqrt %16 : f32
    %18 = vector.broadcast %11 : f32 to vector<2x2x128xf32>
    %19 = arith.subf %1, %18 : vector<2x2x128xf32>
    %20 = vector.broadcast %17 : f32 to vector<2x2x128xf32>
    %21 = arith.mulf %19, %20 : vector<2x2x128xf32>
    %cst_8 = arith.constant 0.000000e+00 : f32
    %22 = vector.broadcast %cst_8 : f32 to vector<2x2x128xf32>
    %23 = arith.maximumf %21, %22 : vector<2x2x128xf32>
    %c0_9 = arith.constant 0 : index
    %c0_10 = arith.constant 0 : index
    %c0_11 = arith.constant 0 : index
    %c0_12 = arith.constant 0 : index
    %24 = vector.load %arg2[%c0_9, %c0_10, %c0_11, %c0_12] : memref<2x1x2x128xf32, #tpu.memory_space<vmem>>, vector<2x1x2x128xf32>
    %25 = vector.shape_cast %24 : vector<2x1x2x128xf32> to vector<2x2x128xf32>
    %26 = vector.shape_cast %23 : vector<2x2x128xf32> to vector<2x1x2x128xf32>
    tpu.vector_store %arg2[%c0_9, %c0_10, %c0_11, %c0_12], %26 {strides = array<i32>} : memref<2x1x2x128xf32, #tpu.memory_space<vmem>>, vector<2x1x2x128xf32>,
    return
  }
  func.func @transform_0(%arg0: i32) -> (i32, i32, i32, i32) {
    %c0_i32 = arith.constant 0 : i32
    %c0_i32_0 = arith.constant 0 : i32
    %c0_i32_1 = arith.constant 0 : i32
    %c0_i32_2 = arith.constant 0 : i32
    return %c0_i32, %arg0, %c0_i32_0, %c0_i32_1 : i32, i32, i32, i32
  }
  func.func @transform_1(%arg0: i32) -> (i32, i32, i32, i32) {
    %c0_i32 = arith.constant 0 : i32
    %c0_i32_0 = arith.constant 0 : i32
    %c0_i32_1 = arith.constant 0 : i32
    %c0_i32_2 = arith.constant 0 : i32
    return %c0_i32, %arg0, %c0_i32_0, %c0_i32_1 : i32, i32, i32, i32
  }
}

</mosaic_0001>

<bundles_post_ra>
// kernel: tpu_custom_call.1
= control target key start
LH: loop header
LB: loop body
LE: loop exit
PB: predicated region body
PF: predicated region fallthrough
CT: control target
= control target key end

     0   :  { %6 = vsyncpa [#allocation3], 0  ;;  %s612_s0 = inlined_call_operand.hbm [shape: f32[2,4,2,128], index: 0, kind: input, shape index: {}]   ;;  %s613_s1 = inlined_call_operand.hbm [shape: f32[2,4,2,128], index: 1, kind: output, shape index: {}]  }
   0x1   :  { %8 = vsyncpa [#allocation3 + $0x1], 0 }
   0x2   :  { %9 = vsyncpa [#allocation4], 0 }
   0x3   :  { %11 = vsyncpa [#allocation4 + $0x1], 0  ;;  %s454_s6 = smov 0   ;;  %s456_s7 = smov 0  }
   0x4   :  { %s458_s8 = smov 0   ;;  %s460_s9 = smov 0  }
   0x5 LB: > { %s475_s10 = sadd.s32 4294967295, %s433_s9   ;;  %s268_s11 = sadd.s32 4294967294, %s433_s9   ;;  %s433_s9 = sphi %s460_s9, %s628_s9   ;;  %s429_s8 = sphi %s458_s8, %s627_s8   ;;  %s425_s7 = sphi %s456_s7, %s626_s7   ;;  %s421_s6 = sphi %s454_s6, %s625_s6  }
   0x6   : > { %s479_s12 = sadd.s32 1, %s433_s9   ;;  %s24_s13 = sadd.s32 1, %s429_s8 }
   0x7   : > { %s21_s14 = ssub.s32 %s433_s9, %s479_s12  ;;  %p31_p0 = scmp.ne.s32.totalorder %s429_s8, %s425_s7 }
   0x8   : > { %p22_p1 = scmp.eq.s32.totalorder %s21_s14, 0  ;;  %p32_p2 = scmp.eq.s32.totalorder %s433_s9, 0 }
   0x9   : > { %p37_p3 = scmp.ne.s32.totalorder %s425_s7, %s421_s6  ;;  %p38_p4 = scmp.eq.s32.totalorder %s475_s10, 0 }
   0xa   : > { %s491_s15 = scalar_select %p22_p1, %s429_s8, %s24_s13  }
   0xb   : > { %p493_p5 = por %p32_p2, %p31_p0  ;;  %p497_p6 = por %p38_p4, %p37_p3 }
   0xc   : > { %p61_p7 = scmp.eq.s32.totalorder %s475_s10, 3  ;;  %p67_p8 = scmp.eq.s32.totalorder %s268_s11, 3 }
   0xd   : > { %s617_s17 = scalar_select %p497_p6, 1, 0 }
   0xe   : > { %p298_p9 = scmp.lt.s32.totalorder %s433_s9, 4  ;;  %p503_p10 = por %p61_p7, %p31_p0 }
   0xf   : > { %p507_p11 = por %p67_p8, %p37_p3  ;;  %s87_s20 = sand.u32 1, %s429_s8  }
  0x10   : > { %s618_s18 = scalar_select %p503_p10, 1, 0 }
  0x11   : > { %s619_s19 = scalar_select %p507_p11, 1, 0 }
  0x12   : > { %s272_s21 = sshll.u32 %s433_s9, 5  ;;  %s271_s22 = sshll.u32 %s87_s20, 2 }
  0x13   : > { %s516_s25 = scalar_lea.hbm %s612_s0, %s272_s21  ;;  %s91_s26 = scalar_lea.vmem [#allocation2], %s271_s22 }
  0x14   : > { %s97_s27 = sshll.u32 %s91_s26, 4  ;;  %p520_p12 = pnand %p298_p9, %p493_p5  ;;  %s524_s27 = int_to_ptr.vmem [resolvable:$true] %s97_s27 }
  0x15   : > { %s527_s29 = scalar_lea.sflag [#allocation3], %s87_s20  ;;  %s341_s30 = scalar_lea.hbm %s516_s25, 64 }
  0x16   : > { %p342_p0 = scmp.ne.s32.totalorder %s516_s25, %s341_s30  ;;  %p343_p1 = pneg %p520_p12 }
  0x17   : > { %s346_s4 = scalar_lea.hbm %s612_s0, 256  ;;  %p347_p4 = scmp.lt.s32.totalorder %s516_s25, %s612_s0 }
  0x18   : > { %p344_p2 = pnand %p343_p1, %p342_p0  ;;  %p348_p5 = scmp.lt.s32.totalorder %s346_s4, %s341_s30 }
  0x1a   : > { %p345_p3 = pneg %p344_p2  ;;  %p349_p7 = por %p348_p5, %p347_p4 }
  0x1c   : > { %p350_p8 = pnand %p349_p7, %p345_p3 }
  0x1e   : > { %353 = shalt.err (!%p350_p8)
}
  0x1f   : > { %s354_s13 = scalar_lea.vmem %s524_s27, 64  ;;  %s435_s14 = smov [#allocation2]  }
  0x20   : > { %p355_p9 = scmp.ne.s32.totalorder %s524_s27, %s354_s13  ;;  %s359_s16 = sshll.u32 %s435_s14, 4  ;;  %s360_s16 = int_to_ptr.vmem [resolvable:$false] %s359_s16 }
  0x21   : > { %s361_s20 = scalar_lea.vmem %s360_s16, 128  ;;  %p362_p2 = scmp.lt.s32.totalorder %s524_s27, %s360_s16 }
  0x22   : > { %p357_p13 = pnand %p355_p9, %p343_p1  ;;  %p363_p11 = scmp.lt.s32.totalorder %s361_s20, %s354_s13 }
  0x24   : > { %p358_p0 = pneg %p357_p13  ;;  %p364_p10 = por %p363_p11, %p362_p2 }
  0x26   : > { %p365_p6 = pnand %p364_p10, %p358_p0 }
  0x28   : > { %368 = shalt.err (!%p365_p6)
}
  0x29   : > { %s436_s21 = smov 128   ;;  %s437_s22 = smov 32  }
  0x2a   : > { %s438_s23 = smov 2   ;;  %p105_p13 = scmp.lt.s32.totalorder %s433_s9, 5 }
  0x2b   : > { %293 = dma.hbm_to_vmem [thread:$0]  (!%p520_p12), %s516_s25, 64, %s524_s27, %s527_s29, %s436_s21, %s437_s22, %s438_s23  }
  0x2c   : > { %p621_p1 = scmp.ge.s32.totalorder %s433_s9, 1 }
  0x2e   : > { %p106_p3 = pnand %p621_p1, %p105_p13 }
  0x2f   : > { %s552_s24 = sand.u32 (!%p106_p3), 1, %s425_s7   ;;  %p622_p6 = scmp.ne.s32.totalorder (!%p106_p3), %s617_s17, 0 }
  0x30   : > { %109 = sbr.rel (%p106_p3) target bundleno = 354 (0x162), region = 24  ;;  %s274_s26 = sshll.u32 (!%p106_p3), %s552_s24, 2 }
  0x31   : > { %s112_s30 = scalar_lea.sflag (!%p106_p3), [#allocation3], %s552_s24  ;;  %s115_s2 = scalar_lea.vmem (!%p106_p3), [#allocation2], %s274_s26 }
  0x35   : > { %412 = dma.done.wait (%p622_p6), %s112_s30, 64  }
  0x36   : > { %414 = vsyncadd (%p622_p6), %s112_s30, 4294967232  ;;  %vm136_vm0 = vcmask 1041408   ;;  %v134_v0 = vld [vmem:[%s115_s2] sm:$0x3]  ;;  %v135_v1 = vld [vmem:[%s115_s2 + $0x2] sm:$0x3] }
  0x37   : > { %v137_v2 = vsel %vm136_vm0, %v134_v0, 0.0  ;;  %v138_v3 = vsel %vm136_vm0, %v135_v1, 0.0  ;;  %v149_v4 = vmul.f32 %v134_v0, %v134_v0  ;;  %v150_v5 = vmul.f32 %v135_v1, %v135_v1  ;;  %s439_s4 = smov 0.0   ;;  %s133_s13 = scalar_lea.vmem [#allocation5], %s274_s26 }
  0x38   : > { %v139_v6 = vadd.f32 %v138_v3, %v137_v2  ;;  %s195_s14 = sshll.u32 %s133_s13, 4  ;;  %s277_s20 = sshll.u32 %s475_s10, 5  ;;  %s565_s14 = int_to_ptr.vmem [resolvable:$true] %s195_s14 }
  0x39   : > { %v151_v7 = vsel %vm136_vm0, %v149_v4, 0.0  ;;  %v152_v8 = vsel %vm136_vm0, %v150_v5, 0.0  ;;  %s570_s23 = scalar_lea.hbm %s613_s1, %s277_s20  ;;  %s183_s26 = scalar_lea.sflag [#allocation4], %s552_s24 }
  0x3a   : > { %140 = vadd.xlane.f32.xlu0 %v139_v6  ;;  %v153_v9 = vadd.f32 %v152_v8, %v151_v7  ;;  %s369_s30 = scalar_lea.vmem %s565_s14, 64  ;;  %p623_p11 = scmp.ne.s32.totalorder %s618_s18, 0 }
  0x3b   : > { %p370_p10 = scmp.ne.s32.totalorder %s565_s14, %s369_s30  ;;  %s440_s10 = smov [#allocation5]  }
  0x3c   : > { %s373_s2 = sshll.u32 %s440_s10, 4  ;;  %s374_s2 = int_to_ptr.vmem [resolvable:$false] %s373_s2 }
  0x3d   : > { %p371_p12 = pnand %p370_p10, %p623_p11  ;;  %p376_p5 = scmp.lt.s32.totalorder %s565_s14, %s374_s2 }
  0x3e   : > { %154 = vadd.xlane.f32.xlu0 %v153_v9 }
  0x3f   : > { %p372_p4 = pneg %p371_p12 }
  0xc3   : > { %v141_v10 = vpop.xlane.xlu0 %140 }
  0xc4   : > { %v142_v11 = vrot.slane %v141_v10, 4 }
  0xc6   : > { %v143_v12 = vadd.f32 %v142_v11, %v141_v10 }
  0xc7   : > { %v155_v13 = vpop.xlane.xlu0 %154 }
  0xc8   : > { %v144_v14 = vrot.slane %v143_v12, 2  ;;  %v156_v15 = vrot.slane %v155_v13, 4 }
  0xca   : > { %v157_v16 = vadd.f32 %v156_v15, %v155_v13  ;;  %v145_v17 = vadd.f32 %v144_v14, %v143_v12 }
  0xcc   : > { %v158_v18 = vrot.slane %v157_v16, 2  ;;  %v146_v19 = vrot.slane %v145_v17, 1 }
  0xce   : > { %v159_v20 = vadd.f32 %v158_v18, %v157_v16  ;;  %v147_v21 = vadd.f32 %v146_v19, %v145_v17 }
  0xd0   : > { %280 = vpush %v147_v21  ;;  %v160_v22 = vrot.slane %v159_v20, 1 }
  0xd2   : > { %v161_v23 = vadd.f32 %v160_v22, %v159_v20 }
  0xd4   : > { %282 = vpush %v161_v23 }
 0x101   : > { %s281_s17 = spop %280 }
 0x102   : > { %s163_s25 = smul.f32 0.001953125, %s281_s17  ;;  %s375_s17 = scalar_lea.vmem %s374_s2, 128 }
 0x103   : > { %p377_p7 = scmp.lt.s32.totalorder %s375_s17, %s369_s30 }
 0x104   : > { %s165_s27 = smul.f32 %s163_s25, %s163_s25  ;;  %v172_v26 = vstv %s163_s25 }
 0x105   : > { %s283_s28 = spop %282  ;;  %v173_v27 = vsub.f32 %v134_v0, %v172_v26  ;;  %v174_v28 = vsub.f32 %v135_v1, %v172_v26  ;;  %p378_p8 = por %p377_p7, %p376_p5 }
 0x106   : > { %s164_s29 = smul.f32 0.001953125, %s283_s28 }
 0x107   : > { %p379_p9 = pnand %p378_p8, %p372_p4 }
 0x108   : > { %s166_s3 = ssub.f32 %s164_s29, %s165_s27 }
 0x10a   : > { %s167_s5 = smax.f32 %s439_s4, %s166_s3 }
 0x10b   : > { %s168_s11 = sadd.f32 1e-05, %s167_s5 }
 0x10d   : > { %v169_v24 = vstv %s168_s11 }
 0x10e   : > { %339 = vrsqrt.f32 %v169_v24 }
 0x11b   : > { %v340_v25 = vpop.eup %339 }
 0x11c   : > { %284 = vpush %v340_v25 }
 0x14d   : > { %s285_s16 = spop %284 }
 0x14e   : > { %v175_v29 = vstv %s285_s16 }
 0x14f   : > { %v176_v30 = vmul.f32 %v175_v29, %v173_v27  ;;  %v177_v31 = vmul.f32 %v175_v29, %v174_v28 }
 0x151   : > { %v178_v32 = vmax.f32 %v176_v30, 0.0  ;;  %v179_v33 = vmax.f32 %v177_v31, 0.0 }
 0x153   : > { %180 = vst [vmem:[%s133_s13] sm:$0x3] %v178_v32  ;;  %181 = vst [vmem:[%s133_s13 + $0x2] sm:$0x3] %v179_v33 }
 0x154   : > { %382 = shalt.err (!%p379_p9)
}
 0x155   : > { %s383_s25 = scalar_lea.hbm %s570_s23, 64  ;;  %s387_s29 = scalar_lea.hbm %s613_s1, 256 }
 0x156   : > { %p384_p0 = scmp.ne.s32.totalorder %s570_s23, %s383_s25  ;;  %p388_p1 = scmp.lt.s32.totalorder %s570_s23, %s613_s1 }
 0x157   : > { %p389_p3 = scmp.lt.s32.totalorder %s387_s29, %s383_s25 }
 0x158   : > { %p385_p2 = pnand %p384_p0, %p623_p11 }
 0x159   : > { %p390_p6 = por %p389_p3, %p388_p1 }
 0x15a   : > { %p386_p13 = pneg %p385_p2 }
 0x15c   : > { %p391_p10 = pnand %p390_p6, %p386_p13 }
 0x15e   : > { %394 = shalt.err (!%p391_p10)
}
 0x15f   : > { %s441_s5 = smov 32   ;;  %s442_s11 = smov 128  }
 0x160   : > { %s443_s13 = smov 2  }
 0x161   : > { %288 = dma.vmem_to_hbm [thread:$0]  (%p623_p11), %s565_s14, 64, %s570_s23, %s183_s26, %s441_s5, %s442_s11, %s443_s13  }
 0x162 PF: > { %p299_p12 = scmp.ge.s32.totalorder %s433_s9, 2  ;;  %s210_s16 = sand.u32 1, %s421_s6  }
 0x163   : > { %p624_p4 = scmp.ne.s32.totalorder %s619_s19, 0  ;;  %s211_s20 = scalar_lea.sflag [#allocation4], %s210_s16 }
 0x165   : > { %p295_p5 = pnand %p299_p12, %p624_p4 }
 0x167   : > { %p296_p7 = pneg %p295_p5 }
 0x169   : > { %416 = dma.done.wait (%p296_p7), %s211_s20, 64  }
 0x16a   : > { %418 = vsyncadd (%p296_p7), %s211_s20, 4294967232  ;;  %p14_p8 = scmp.ge.s32.totalorder %s479_s12, 6   ;;  %s625_s6 = smov %s425_s7 }
 0x16b   : > { %s626_s7 = smov %s429_s8  ;;  %s627_s8 = smov %s491_s15 }
 0x16c   : > { %s628_s9 = smov %s479_s12  ;;  %16 = sbr.rel (!%p14_p8) target bundleno = 5 (0x5), region = 69 }
 0x171   :  { %216 = vsyncpa [#allocation3], 1 }
 0x172   :  { %218 = vsyncpa [#allocation3 + $0x1], 1 }
 0x173   :  { %219 = vsyncpa [#allocation4], 1 }
 0x174   :  { %221 = vsyncpa [#allocation4 + $0x1], 1 }

</bundles_post_ra>
